<compile_context>
chip_gen: v7x
topology: tpu7x:2x2x1
jax: 0.10.0
libtpu: 0.0.40
codegen_flags: <defaults>
</compile_context>

<pallas_src>
import functools

import jax
import jax.numpy as jnp
from jax.experimental import pallas as pl
from jax.experimental.pallas import tpu as pltpu


# ----------------------------------------------------------------------------
# Fused encoder-stack kernel: one grid step = one layer of one batch element
# ----------------------------------------------------------------------------
def _layernorm(x, gamma, beta, eps=1e-5):
    mean = jnp.mean(x, axis=-1, keepdims=True)
    var = jnp.mean(jnp.square(x - mean), axis=-1, keepdims=True)   # biased (torch)
    return (x - mean) * jax.lax.rsqrt(var + eps) * gamma + beta


def _encoder_stack_kernel(*refs, num_heads, has_pos, exp_bf16):
    if has_pos:
        (x_ref, pos_ref, wqk_ref, wv_ref, wo_ref, w1_ref, w2_ref,
         vecd_ref, b1_ref, out_ref, heads_vmem) = refs
    else:
        (x_ref, wqk_ref, wv_ref, wo_ref, w1_ref, w2_ref,
         vecd_ref, b1_ref, out_ref, heads_vmem) = refs
        pos_ref = None

    l = pl.program_id(1)
    D = x_ref.shape[-1]
    dh = D // num_heads

    # out_ref (f32, constant block index along the layer axis) is the running
    # activation state -> resident in VMEM across layers, written to HBM once.
    @pl.when(l == 0)
    def _():
        out_ref[...] = x_ref[...].astype(jnp.float32)

    x = out_ref[...]                                        # (L, D) f32

    # packed per-layer vectors: [bq, bk, bv, bo, b2, g1, be1, g2, be2]
    vecs = vecd_ref[l]                                      # (9, D) f32
    bq, bk, bv, bo = vecs[0:1], vecs[1:2], vecs[2:3], vecs[3:4]
    b2 = vecs[4:5]
    g1, be1, g2, be2 = vecs[5:6], vecs[6:7], vecs[7:8], vecs[8:9]

    # ---- self-attention: q = k = x + pos, v = x (DETR convention) ----------
    qk_in = x + pos_ref[...].astype(jnp.float32) if has_pos else x
    qk_in_bf = qk_in.astype(jnp.bfloat16)
    x_bf = x.astype(jnp.bfloat16)

    # fused Q|K projection: one matmul, N = 2*D lanes (MXU-dense); V: N = D.
    qk = jnp.dot(qk_in_bf, wqk_ref[l], preferred_element_type=jnp.float32)
    q = qk[:, :D] + bq                                      # 1/sqrt(dh) folded in
    k = qk[:, D:] + bk
    v = jnp.dot(x_bf, wv_ref[l], preferred_element_type=jnp.float32) + bv

    q_bf = q.astype(jnp.bfloat16)
    k_bf = k.astype(jnp.bfloat16)
    v_bf = v.astype(jnp.bfloat16)

    qkt_dims = (((1,), (1,)), ((), ()))                     # contract last dims: no .T copy
    exp_dtype = jnp.bfloat16 if exp_bf16 else jnp.float32

    for h in range(num_heads):                              # static unrolled head loop
        sl = slice(h * dh, (h + 1) * dh)
        s = jax.lax.dot_general(q_bf[:, sl], k_bf[:, sl], qkt_dims,
                                preferred_element_type=jnp.float32)     # (L, L) f32
        s = s - jnp.max(s, axis=-1, keepdims=True)
        p = jnp.exp(s.astype(exp_dtype))                    # bf16 exp on v6e/v7x
        inv = pl.reciprocal(
            jnp.sum(p.astype(jnp.float32), axis=-1, keepdims=True), approx=True)
        o_h = jnp.dot(p.astype(jnp.bfloat16), v_bf[:, sl],
                      preferred_element_type=jnp.float32) * inv         # (L, dh)
        # write at static lane offsets instead of concatenating lane-thin slabs
        heads_vmem[:, sl] = o_h

    # single dense output projection (K = D) on the assembled heads
    attn = jnp.dot(heads_vmem[...].astype(jnp.bfloat16), wo_ref[l],
                   preferred_element_type=jnp.float32) + bo

    x = _layernorm(x + attn, g1, be1)                       # residual + norm1

    # ---- feed-forward -------------------------------------------------------
    h1 = jnp.dot(x.astype(jnp.bfloat16), w1_ref[l],
                 preferred_element_type=jnp.float32) + b1_ref[l]
    h1 = jnp.maximum(h1, 0.0)
    y = jnp.dot(h1.astype(jnp.bfloat16), w2_ref[l],
                preferred_element_type=jnp.float32) + b2

    x = _layernorm(x + y, g2, be2)                          # residual + norm2

    out_ref[...] = x


# ----------------------------------------------------------------------------
# Public wrapper: TransformerEncoder.forward (norm=None, eval mode)
# ----------------------------------------------------------------------------
def transformer_encoder(params, src, mask=None, src_key_padding_mask=None,
                        pos=None, attn_bias=None):
    assert mask is None and src_key_padding_mask is None and attn_bias is None

    x = jnp.transpose(src, (1, 0, 2)).astype(jnp.float32)   # (B, L, D) batch-first
    B, L, D = x.shape
    num_layers = params["wqk"].shape[0]
    H = params["num_heads"]
    Dff = params["w1"].shape[-1]
    has_pos = pos is not None

    # bf16 exponent only where the EUP supports bf16 (v6e / v7x)
    kind = jax.devices()[0].device_kind.lower()
    exp_bf16 = ("v6" in kind) or ("v7" in kind)

    kernel = functools.partial(_encoder_stack_kernel, num_heads=H,
                               has_pos=has_pos, exp_bf16=exp_bf16)

    act_spec = pl.BlockSpec((None, L, D), lambda b, l: (b, 0, 0))

    def resident_spec(arr):
        # full stacked-layer array, constant block index -> DMA'd once for the
        # whole grid; the kernel indexes the layer with program_id(1).
        nd = arr.ndim
        return pl.BlockSpec(arr.shape, lambda b, l: (0,) * nd)

    weight_names = ("wqk", "wv", "wo", "w1", "w2", "vecd", "b1")
    weights = [params[n] for n in weight_names]

    in_specs = [act_spec]
    inputs = [x]
    if has_pos:
        in_specs.append(act_spec)
        inputs.append(jnp.transpose(pos, (1, 0, 2)).astype(jnp.float32))
    in_specs += [resident_spec(w) for w in weights]
    inputs += weights

    # Explicit VMEM budget: resident weight stack + double-buffered act/pos +
    # resident out block + attention/FFN temporaries.  Only override the scoped
    # default when needed; stay under v7x's 64 MiB physical per TensorCore.
    weight_bytes = sum(int(w.size) * w.dtype.itemsize for w in weights)
    act_bytes = (1 + int(has_pos)) * 2 * L * D * 4 + L * D * 4
    tmp_bytes = 4 * L * max(L, Dff) * 4 + L * D * 4
    est = int(1.25 * (weight_bytes + act_bytes + tmp_bytes))
    vmem_limit = None if est <= 32 * 1024 * 1024 else min(est, 56 * 1024 * 1024)

    out = pl.pallas_call(
        kernel,
        out_shape=jax.ShapeDtypeStruct((B, L, D), jnp.float32),
        grid=(B, num_layers),
        in_specs=in_specs,
        out_specs=pl.BlockSpec((None, L, D), lambda b, l: (b, 0, 0)),
        scratch_shapes=[pltpu.VMEM((L, D), jnp.float32)],   # per-head output staging
        compiler_params=pltpu.CompilerParams(
            dimension_semantics=("parallel", "arbitrary"),
            vmem_limit_bytes=vmem_limit),
    )(*inputs)

    return jnp.transpose(out, (1, 0, 2)).astype(src.dtype)  # back to (L, B, D)


# ----------------------------------------------------------------------------
# Deterministic synthetic parameter init (stacked per layer, MXU weights bf16)
# ----------------------------------------------------------------------------
def init_encoder_params(key, num_layers, d_model, num_heads, dim_ff, scale=0.05):
    dh = d_model // num_heads
    qk_scale = 1.0 / float(dh) ** 0.5

    def dense(k, din, dout):
        kw, kb = jax.random.split(k)
        return (jax.random.normal(kw, (din, dout), jnp.float32) * scale,
                jax.random.normal(kb, (1, dout), jnp.float32) * scale)

    stacks = {n: [] for n in ("wqk", "wv", "wo", "w1", "w2", "vecd", "b1")}
    for lk in jax.random.split(key, num_layers):
        kq, kk, kv, ko, kf1, kf2 = jax.random.split(lk, 6)
        wq, bq = dense(kq, d_model, d_model)
        wk, bk = dense(kk, d_model, d_model)
        wv, bv = dense(kv, d_model, d_model)
        wo, bo = dense(ko, d_model, d_model)
        w1, b1 = dense(kf1, d_model, dim_ff)
        w2, b2 = dense(kf2, dim_ff, d_model)
        g1 = jnp.ones((1, d_model), jnp.float32)
        be1 = jnp.zeros((1, d_model), jnp.float32)
        g2 = jnp.ones((1, d_model), jnp.float32)
        be2 = jnp.zeros((1, d_model), jnp.float32)
        # fuse Q|K (same input x+pos) and fold the 1/sqrt(dh) scale into Q
        stacks["wqk"].append(jnp.concatenate([wq * qk_scale, wk], axis=1))
        stacks["wv"].append(wv)
        stacks["wo"].append(wo)
        stacks["w1"].append(w1)
        stacks["w2"].append(w2)
        stacks["b1"].append(b1)
        stacks["vecd"].append(jnp.concatenate(
            [bq * qk_scale, bk, bv, bo, b2, g1, be1, g2, be2], axis=0))  # (9, D)

    bf16_keys = ("wqk", "wv", "wo", "w1", "w2")              # MXU weight inputs
    params = {n: jnp.stack(v).astype(jnp.bfloat16 if n in bf16_keys else jnp.float32)
              for n, v in stacks.items()}
    params["num_heads"] = num_heads
    return params


# ----------------------------------------------------------------------------
if __name__ == "__main__":
    L, B = 8, 2                   # sequence length, batch (B>=2 keeps both v7x TCs busy)
    D, H, Dff = 32, 4, 64         # d_model, heads, feedforward dim
    NUM_LAYERS = 2

    key = jax.random.PRNGKey(0)
    k1, k2, kp = jax.random.split(key, 3)
    src = jax.random.normal(k1, (L, B, D), jnp.float32)
    pos = jax.random.normal(k2, (L, B, D), jnp.float32)

    params = init_encoder_params(kp, NUM_LAYERS, D, H, Dff)

    out = transformer_encoder(params, src, pos=pos)
    out = jax.block_until_ready(out)

    assert out.shape == (L, B, D), out.shape
    assert bool(jnp.all(jnp.isfinite(out)))
    print("KERNEL_OK")
</pallas_src>

<mosaic_0001>
module attributes {stable_mosaic.version = 11 : i64} {
  func.func @_encoder_stack_kernel(%arg0: i32, %arg1: i32, %arg2: memref<1x8x32xf32, #tpu.memory_space<vmem>>, %arg3: memref<1x8x32xf32, #tpu.memory_space<vmem>>, %arg4: memref<2x32x64xbf16, #tpu.memory_space<vmem>>, %arg5: memref<2x32x32xbf16, #tpu.memory_space<vmem>>, %arg6: memref<2x32x32xbf16, #tpu.memory_space<vmem>>, %arg7: memref<2x32x64xbf16, #tpu.memory_space<vmem>>, %arg8: memref<2x64x32xbf16, #tpu.memory_space<vmem>>, %arg9: memref<2x9x32xf32, #tpu.memory_space<vmem>>, %arg10: memref<2x1x64xf32, #tpu.memory_space<vmem>>, %arg11: memref<1x8x32xf32, #tpu.memory_space<vmem>>, %arg12: memref<8x32xf32, #tpu.memory_space<vmem>>) attributes {dimension_semantics = [#tpu.dimension_semantics<parallel>, #tpu.dimension_semantics<arbitrary>], iteration_bounds = array<i64: 2, 2>, scalar_prefetch = 0 : i64, scratch_operands = 1 : i64, tpu.core_type = #tpu.core_type<tc>, window_params = [{transform_indices = @transform_0, window_bounds = array<i64: 1, 8, 32>}, {transform_indices = @transform_1, window_bounds = array<i64: 1, 8, 32>}, {pipeline_mode = #tpu.pipeline_mode<synchronous>, transform_indices = @transform_2, window_bounds = array<i64: 2, 32, 64>}, {pipeline_mode = #tpu.pipeline_mode<synchronous>, transform_indices = @transform_3, window_bounds = array<i64: 2, 32, 32>}, {pipeline_mode = #tpu.pipeline_mode<synchronous>, transform_indices = @transform_4, window_bounds = array<i64: 2, 32, 32>}, {pipeline_mode = #tpu.pipeline_mode<synchronous>, transform_indices = @transform_5, window_bounds = array<i64: 2, 32, 64>}, {pipeline_mode = #tpu.pipeline_mode<synchronous>, transform_indices = @transform_6, window_bounds = array<i64: 2, 64, 32>}, {pipeline_mode = #tpu.pipeline_mode<synchronous>, transform_indices = @transform_7, window_bounds = array<i64: 2, 9, 32>}, {pipeline_mode = #tpu.pipeline_mode<synchronous>, transform_indices = @transform_8, window_bounds = array<i64: 2, 1, 64>}, {transform_indices = @transform_9, window_bounds = array<i64: 1, 8, 32>}]} {
    %c0_i32 = arith.constant 0 : i32
    %0 = arith.cmpi eq, %arg1, %c0_i32 : i32
    %1 = arith.extui %0 : i1 to i32
    %c0_i32_0 = arith.constant 0 : i32
    %2 = arith.cmpi ne, %1, %c0_i32_0 : i32
    scf.if %2 {
      %c0_61 = arith.constant 0 : index
      %c0_62 = arith.constant 0 : index
      %c0_63 = arith.constant 0 : index
      %185 = vector.load %arg2[%c0_61, %c0_62, %c0_63] : memref<1x8x32xf32, #tpu.memory_space<vmem>>, vector<1x8x32xf32>
      %186 = vector.shape_cast %185 : vector<1x8x32xf32> to vector<8x32xf32>
      %c0_64 = arith.constant 0 : index
      %c0_65 = arith.constant 0 : index
      %c0_66 = arith.constant 0 : index
      %187 = vector.load %arg11[%c0_64, %c0_65, %c0_66] : memref<1x8x32xf32, #tpu.memory_space<vmem>>, vector<1x8x32xf32>
      %188 = vector.shape_cast %187 : vector<1x8x32xf32> to vector<8x32xf32>
      %189 = vector.shape_cast %186 : vector<8x32xf32> to vector<1x8x32xf32>
      tpu.vector_store %arg11[%c0_64, %c0_65, %c0_66], %189 {strides = array<i32>} : memref<1x8x32xf32, #tpu.memory_space<vmem>>, vector<1x8x32xf32>,
    } else {
    }
    %c0 = arith.constant 0 : index
    %c0_1 = arith.constant 0 : index
    %c0_2 = arith.constant 0 : index
    %3 = vector.load %arg11[%c0, %c0_1, %c0_2] : memref<1x8x32xf32, #tpu.memory_space<vmem>>, vector<1x8x32xf32>
    %4 = vector.shape_cast %3 : vector<1x8x32xf32> to vector<8x32xf32>
    %5 = arith.index_cast %arg1 : i32 to index
    %c0_3 = arith.constant 0 : index
    %c0_4 = arith.constant 0 : index
    %6 = vector.load %arg9[%5, %c0_3, %c0_4] : memref<2x9x32xf32, #tpu.memory_space<vmem>>, vector<1x9x32xf32>
    %7 = vector.shape_cast %6 : vector<1x9x32xf32> to vector<9x32xf32>
    %8 = vector.extract_strided_slice %7 {offsets = [0, 0], sizes = [1, 32], strides = [1, 1]} : vector<9x32xf32> to vector<1x32xf32>
    %9 = vector.extract_strided_slice %7 {offsets = [1, 0], sizes = [1, 32], strides = [1, 1]} : vector<9x32xf32> to vector<1x32xf32>
    %10 = vector.extract_strided_slice %7 {offsets = [2, 0], sizes = [1, 32], strides = [1, 1]} : vector<9x32xf32> to vector<1x32xf32>
    %11 = vector.extract_strided_slice %7 {offsets = [3, 0], sizes = [1, 32], strides = [1, 1]} : vector<9x32xf32> to vector<1x32xf32>
    %12 = vector.extract_strided_slice %7 {offsets = [4, 0], sizes = [1, 32], strides = [1, 1]} : vector<9x32xf32> to vector<1x32xf32>
    %13 = vector.extract_strided_slice %7 {offsets = [5, 0], sizes = [1, 32], strides = [1, 1]} : vector<9x32xf32> to vector<1x32xf32>
    %14 = vector.extract_strided_slice %7 {offsets = [6, 0], sizes = [1, 32], strides = [1, 1]} : vector<9x32xf32> to vector<1x32xf32>
    %15 = vector.extract_strided_slice %7 {offsets = [7, 0], sizes = [1, 32], strides = [1, 1]} : vector<9x32xf32> to vector<1x32xf32>
    %16 = vector.extract_strided_slice %7 {offsets = [8, 0], sizes = [1, 32], strides = [1, 1]} : vector<9x32xf32> to vector<1x32xf32>
    %c0_5 = arith.constant 0 : index
    %c0_6 = arith.constant 0 : index
    %c0_7 = arith.constant 0 : index
    %17 = vector.load %arg3[%c0_5, %c0_6, %c0_7] : memref<1x8x32xf32, #tpu.memory_space<vmem>>, vector<1x8x32xf32>
    %18 = vector.shape_cast %17 : vector<1x8x32xf32> to vector<8x32xf32>
    %19 = arith.addf %4, %18 : vector<8x32xf32>
    %20 = arith.truncf %19 : vector<8x32xf32> to vector<8x32xbf16>
    %21 = arith.truncf %4 : vector<8x32xf32> to vector<8x32xbf16>
    %22 = arith.index_cast %arg1 : i32 to index
    %c0_8 = arith.constant 0 : index
    %c0_9 = arith.constant 0 : index
    %23 = vector.load %arg4[%22, %c0_8, %c0_9] : memref<2x32x64xbf16, #tpu.memory_space<vmem>>, vector<1x32x64xbf16>
    %24 = vector.shape_cast %23 : vector<1x32x64xbf16> to vector<32x64xbf16>
    %cst = arith.constant dense<0.000000e+00> : vector<8x64xf32>
    %25 = tpu.matmul %20, %24, %cst {dimension_numbers = #tpu.dot_dimension_numbers<[1], [0], [0], [1], [0, 0, 1, 1], [], []>} : vector<8x32xbf16>, vector<32x64xbf16>, vector<8x64xf32> -> vector<8x64xf32>
    %26 = vector.extract_strided_slice %25 {offsets = [0, 0], sizes = [8, 32], strides = [1, 1]} : vector<8x64xf32> to vector<8x32xf32>
    %27 = vector.broadcast %8 : vector<1x32xf32> to vector<8x32xf32>
    %28 = arith.addf %26, %27 : vector<8x32xf32>
    %29 = vector.extract_strided_slice %25 {offsets = [0, 32], sizes = [8, 32], strides = [1, 1]} : vector<8x64xf32> to vector<8x32xf32>
    %30 = vector.broadcast %9 : vector<1x32xf32> to vector<8x32xf32>
    %31 = arith.addf %29, %30 : vector<8x32xf32>
    %32 = arith.index_cast %arg1 : i32 to index
    %c0_10 = arith.constant 0 : index
    %c0_11 = arith.constant 0 : index
    %33 = vector.load %arg5[%32, %c0_10, %c0_11] : memref<2x32x32xbf16, #tpu.memory_space<vmem>>, vector<1x32x32xbf16>
    %34 = vector.shape_cast %33 : vector<1x32x32xbf16> to vector<32x32xbf16>
    %cst_12 = arith.constant dense<0.000000e+00> : vector<8x32xf32>
    %35 = tpu.matmul %21, %34, %cst_12 {dimension_numbers = #tpu.dot_dimension_numbers<[1], [0], [0], [1], [0, 0, 1, 1], [], []>} : vector<8x32xbf16>, vector<32x32xbf16>, vector<8x32xf32> -> vector<8x32xf32>
    %36 = vector.broadcast %10 : vector<1x32xf32> to vector<8x32xf32>
    %37 = arith.addf %35, %36 : vector<8x32xf32>
    %38 = arith.truncf %28 : vector<8x32xf32> to vector<8x32xbf16>
    %39 = arith.truncf %31 : vector<8x32xf32> to vector<8x32xbf16>
    %40 = arith.truncf %37 : vector<8x32xf32> to vector<8x32xbf16>
    %41 = vector.extract_strided_slice %38 {offsets = [0, 0], sizes = [8, 8], strides = [1, 1]} : vector<8x32xbf16> to vector<8x8xbf16>
    %42 = vector.extract_strided_slice %39 {offsets = [0, 0], sizes = [8, 8], strides = [1, 1]} : vector<8x32xbf16> to vector<8x8xbf16>
    %cst_13 = arith.constant dense<0.000000e+00> : vector<8x8xf32>
    %43 = tpu.matmul %41, %42, %cst_13 {dimension_numbers = #tpu.dot_dimension_numbers<[1], [1], [0], [0], [0, 0, 1, 0], [], []>} : vector<8x8xbf16>, vector<8x8xbf16>, vector<8x8xf32> -> vector<8x8xf32>
    %cst_14 = arith.constant dense<0xFF800000> : vector<8xf32>
    %44 = vector.multi_reduction <maximumf>, %43, %cst_14 [1] : vector<8x8xf32> to vector<8xf32>
    %45 = vector.shape_cast %44 : vector<8xf32> to vector<8x1xf32>
    %46 = vector.broadcast %45 : vector<8x1xf32> to vector<8x8xf32>
    %47 = arith.subf %43, %46 : vector<8x8xf32>
    %48 = math.exp %47 : vector<8x8xf32>
    %cst_15 = arith.constant dense<0.000000e+00> : vector<8xf32>
    %49 = vector.multi_reduction <add>, %48, %cst_15 [1] : vector<8x8xf32> to vector<8xf32>
    %50 = vector.shape_cast %49 : vector<8xf32> to vector<8x1xf32>
    %51 = tpu.reciprocal %50 {approx = true} : vector<8x1xf32> -> vector<8x1xf32>
    %52 = arith.truncf %48 : vector<8x8xf32> to vector<8x8xbf16>
    %53 = vector.extract_strided_slice %40 {offsets = [0, 0], sizes = [8, 8], strides = [1, 1]} : vector<8x32xbf16> to vector<8x8xbf16>
    %cst_16 = arith.constant dense<0.000000e+00> : vector<8x8xf32>
    %54 = tpu.matmul %52, %53, %cst_16 {dimension_numbers = #tpu.dot_dimension_numbers<[1], [0], [0], [1], [0, 0, 1, 1], [], []>} : vector<8x8xbf16>, vector<8x8xbf16>, vector<8x8xf32> -> vector<8x8xf32>
    %55 = vector.broadcast %51 : vector<8x1xf32> to vector<8x8xf32>
    %56 = arith.mulf %54, %55 : vector<8x8xf32>
    %c0_17 = arith.constant 0 : index
    %c0_18 = arith.constant 0 : index
    %57 = vector.load %arg12[%c0_17, %c0_18] : memref<8x32xf32, #tpu.memory_space<vmem>>, vector<8x8xf32>
    tpu.vector_store %arg12[%c0_17, %c0_18], %56 {strides = array<i32>} : memref<8x32xf32, #tpu.memory_space<vmem>>, vector<8x8xf32>,
    %58 = vector.extract_strided_slice %38 {offsets = [0, 8], sizes = [8, 8], strides = [1, 1]} : vector<8x32xbf16> to vector<8x8xbf16>
    %59 = vector.extract_strided_slice %39 {offsets = [0, 8], sizes = [8, 8], strides = [1, 1]} : vector<8x32xbf16> to vector<8x8xbf16>
    %cst_19 = arith.constant dense<0.000000e+00> : vector<8x8xf32>
    %60 = tpu.matmul %58, %59, %cst_19 {dimension_numbers = #tpu.dot_dimension_numbers<[1], [1], [0], [0], [0, 0, 1, 0], [], []>} : vector<8x8xbf16>, vector<8x8xbf16>, vector<8x8xf32> -> vector<8x8xf32>
    %cst_20 = arith.constant dense<0xFF800000> : vector<8xf32>
    %61 = vector.multi_reduction <maximumf>, %60, %cst_20 [1] : vector<8x8xf32> to vector<8xf32>
    %62 = vector.shape_cast %61 : vector<8xf32> to vector<8x1xf32>
    %63 = vector.broadcast %62 : vector<8x1xf32> to vector<8x8xf32>
    %64 = arith.subf %60, %63 : vector<8x8xf32>
    %65 = math.exp %64 : vector<8x8xf32>
    %cst_21 = arith.constant dense<0.000000e+00> : vector<8xf32>
    %66 = vector.multi_reduction <add>, %65, %cst_21 [1] : vector<8x8xf32> to vector<8xf32>
    %67 = vector.shape_cast %66 : vector<8xf32> to vector<8x1xf32>
    %68 = tpu.reciprocal %67 {approx = true} : vector<8x1xf32> -> vector<8x1xf32>
    %69 = arith.truncf %65 : vector<8x8xf32> to vector<8x8xbf16>
    %70 = vector.extract_strided_slice %40 {offsets = [0, 8], sizes = [8, 8], strides = [1, 1]} : vector<8x32xbf16> to vector<8x8xbf16>
    %cst_22 = arith.constant dense<0.000000e+00> : vector<8x8xf32>
    %71 = tpu.matmul %69, %70, %cst_22 {dimension_numbers = #tpu.dot_dimension_numbers<[1], [0], [0], [1], [0, 0, 1, 1], [], []>} : vector<8x8xbf16>, vector<8x8xbf16>, vector<8x8xf32> -> vector<8x8xf32>
    %72 = vector.broadcast %68 : vector<8x1xf32> to vector<8x8xf32>
    %73 = arith.mulf %71, %72 : vector<8x8xf32>
    %c0_23 = arith.constant 0 : index
    %c8 = arith.constant 8 : index
    %74 = vector.load %arg12[%c0_23, %c8] : memref<8x32xf32, #tpu.memory_space<vmem>>, vector<8x8xf32>
    tpu.vector_store %arg12[%c0_23, %c8], %73 {strides = array<i32>} : memref<8x32xf32, #tpu.memory_space<vmem>>, vector<8x8xf32>,
    %75 = vector.extract_strided_slice %38 {offsets = [0, 16], sizes = [8, 8], strides = [1, 1]} : vector<8x32xbf16> to vector<8x8xbf16>
    %76 = vector.extract_strided_slice %39 {offsets = [0, 16], sizes = [8, 8], strides = [1, 1]} : vector<8x32xbf16> to vector<8x8xbf16>
    %cst_24 = arith.constant dense<0.000000e+00> : vector<8x8xf32>
    %77 = tpu.matmul %75, %76, %cst_24 {dimension_numbers = #tpu.dot_dimension_numbers<[1], [1], [0], [0], [0, 0, 1, 0], [], []>} : vector<8x8xbf16>, vector<8x8xbf16>, vector<8x8xf32> -> vector<8x8xf32>
    %cst_25 = arith.constant dense<0xFF800000> : vector<8xf32>
    %78 = vector.multi_reduction <maximumf>, %77, %cst_25 [1] : vector<8x8xf32> to vector<8xf32>
    %79 = vector.shape_cast %78 : vector<8xf32> to vector<8x1xf32>
    %80 = vector.broadcast %79 : vector<8x1xf32> to vector<8x8xf32>
    %81 = arith.subf %77, %80 : vector<8x8xf32>
    %82 = math.exp %81 : vector<8x8xf32>
    %cst_26 = arith.constant dense<0.000000e+00> : vector<8xf32>
    %83 = vector.multi_reduction <add>, %82, %cst_26 [1] : vector<8x8xf32> to vector<8xf32>
    %84 = vector.shape_cast %83 : vector<8xf32> to vector<8x1xf32>
    %85 = tpu.reciprocal %84 {approx = true} : vector<8x1xf32> -> vector<8x1xf32>
    %86 = arith.truncf %82 : vector<8x8xf32> to vector<8x8xbf16>
    %87 = vector.extract_strided_slice %40 {offsets = [0, 16], sizes = [8, 8], strides = [1, 1]} : vector<8x32xbf16> to vector<8x8xbf16>
    %cst_27 = arith.constant dense<0.000000e+00> : vector<8x8xf32>
    %88 = tpu.matmul %86, %87, %cst_27 {dimension_numbers = #tpu.dot_dimension_numbers<[1], [0], [0], [1], [0, 0, 1, 1], [], []>} : vector<8x8xbf16>, vector<8x8xbf16>, vector<8x8xf32> -> vector<8x8xf32>
    %89 = vector.broadcast %85 : vector<8x1xf32> to vector<8x8xf32>
    %90 = arith.mulf %88, %89 : vector<8x8xf32>
    %c0_28 = arith.constant 0 : index
    %c16 = arith.constant 16 : index
    %91 = vector.load %arg12[%c0_28, %c16] : memref<8x32xf32, #tpu.memory_space<vmem>>, vector<8x8xf32>
    tpu.vector_store %arg12[%c0_28, %c16], %90 {strides = array<i32>} : memref<8x32xf32, #tpu.memory_space<vmem>>, vector<8x8xf32>,
    %92 = vector.extract_strided_slice %38 {offsets = [0, 24], sizes = [8, 8], strides = [1, 1]} : vector<8x32xbf16> to vector<8x8xbf16>
    %93 = vector.extract_strided_slice %39 {offsets = [0, 24], sizes = [8, 8], strides = [1, 1]} : vector<8x32xbf16> to vector<8x8xbf16>
    %cst_29 = arith.constant dense<0.000000e+00> : vector<8x8xf32>
    %94 = tpu.matmul %92, %93, %cst_29 {dimension_numbers = #tpu.dot_dimension_numbers<[1], [1], [0], [0], [0, 0, 1, 0], [], []>} : vector<8x8xbf16>, vector<8x8xbf16>, vector<8x8xf32> -> vector<8x8xf32>
    %cst_30 = arith.constant dense<0xFF800000> : vector<8xf32>
    %95 = vector.multi_reduction <maximumf>, %94, %cst_30 [1] : vector<8x8xf32> to vector<8xf32>
    %96 = vector.shape_cast %95 : vector<8xf32> to vector<8x1xf32>
    %97 = vector.broadcast %96 : vector<8x1xf32> to vector<8x8xf32>
    %98 = arith.subf %94, %97 : vector<8x8xf32>
    %99 = math.exp %98 : vector<8x8xf32>
    %cst_31 = arith.constant dense<0.000000e+00> : vector<8xf32>
    %100 = vector.multi_reduction <add>, %99, %cst_31 [1] : vector<8x8xf32> to vector<8xf32>
    %101 = vector.shape_cast %100 : vector<8xf32> to vector<8x1xf32>
    %102 = tpu.reciprocal %101 {approx = true} : vector<8x1xf32> -> vector<8x1xf32>
    %103 = arith.truncf %99 : vector<8x8xf32> to vector<8x8xbf16>
    %104 = vector.extract_strided_slice %40 {offsets = [0, 24], sizes = [8, 8], strides = [1, 1]} : vector<8x32xbf16> to vector<8x8xbf16>
    %cst_32 = arith.constant dense<0.000000e+00> : vector<8x8xf32>
    %105 = tpu.matmul %103, %104, %cst_32 {dimension_numbers = #tpu.dot_dimension_numbers<[1], [0], [0], [1], [0, 0, 1, 1], [], []>} : vector<8x8xbf16>, vector<8x8xbf16>, vector<8x8xf32> -> vector<8x8xf32>
    %106 = vector.broadcast %102 : vector<8x1xf32> to vector<8x8xf32>
    %107 = arith.mulf %105, %106 : vector<8x8xf32>
    %c0_33 = arith.constant 0 : index
    %c24 = arith.constant 24 : index
    %108 = vector.load %arg12[%c0_33, %c24] : memref<8x32xf32, #tpu.memory_space<vmem>>, vector<8x8xf32>
    tpu.vector_store %arg12[%c0_33, %c24], %107 {strides = array<i32>} : memref<8x32xf32, #tpu.memory_space<vmem>>, vector<8x8xf32>,
    %c0_34 = arith.constant 0 : index
    %c0_35 = arith.constant 0 : index
    %109 = vector.load %arg12[%c0_34, %c0_35] : memref<8x32xf32, #tpu.memory_space<vmem>>, vector<8x32xf32>
    %110 = arith.truncf %109 : vector<8x32xf32> to vector<8x32xbf16>
    %111 = arith.index_cast %arg1 : i32 to index
    %c0_36 = arith.constant 0 : index
    %c0_37 = arith.constant 0 : index
    %112 = vector.load %arg6[%111, %c0_36, %c0_37] : memref<2x32x32xbf16, #tpu.memory_space<vmem>>, vector<1x32x32xbf16>
    %113 = vector.shape_cast %112 : vector<1x32x32xbf16> to vector<32x32xbf16>
    %cst_38 = arith.constant dense<0.000000e+00> : vector<8x32xf32>
    %114 = tpu.matmul %110, %113, %cst_38 {dimension_numbers = #tpu.dot_dimension_numbers<[1], [0], [0], [1], [0, 0, 1, 1], [], []>} : vector<8x32xbf16>, vector<32x32xbf16>, vector<8x32xf32> -> vector<8x32xf32>
    %115 = vector.broadcast %11 : vector<1x32xf32> to vector<8x32xf32>
    %116 = arith.addf %114, %115 : vector<8x32xf32>
    %117 = arith.addf %4, %116 : vector<8x32xf32>
    %cst_39 = arith.constant dense<0.000000e+00> : vector<8xf32>
    %118 = vector.multi_reduction <add>, %117, %cst_39 [1] : vector<8x32xf32> to vector<8xf32>
    %119 = vector.shape_cast %118 : vector<8xf32> to vector<8x1xf32>
    %cst_40 = arith.constant 3.200000e+01 : f32
    %120 = vector.broadcast %cst_40 : f32 to vector<8x1xf32>
    %121 = arith.divf %119, %120 : vector<8x1xf32>
    %122 = vector.broadcast %121 : vector<8x1xf32> to vector<8x32xf32>
    %123 = arith.subf %117, %122 : vector<8x32xf32>
    %124 = arith.mulf %123, %123 : vector<8x32xf32>
    %cst_41 = arith.constant dense<0.000000e+00> : vector<8xf32>
    %125 = vector.multi_reduction <add>, %124, %cst_41 [1] : vector<8x32xf32> to vector<8xf32>
    %126 = vector.shape_cast %125 : vector<8xf32> to vector<8x1xf32>
    %cst_42 = arith.constant 3.200000e+01 : f32
    %127 = vector.broadcast %cst_42 : f32 to vector<8x1xf32>
    %128 = arith.divf %126, %127 : vector<8x1xf32>
    %129 = vector.broadcast %121 : vector<8x1xf32> to vector<8x32xf32>
    %130 = arith.subf %117, %129 : vector<8x32xf32>
    %cst_43 = arith.constant 9.99999974E-6 : f32
    %131 = vector.broadcast %cst_43 : f32 to vector<8x1xf32>
    %132 = arith.addf %128, %131 : vector<8x1xf32>
    %133 = math.rsqrt %132 : vector<8x1xf32>
    %134 = vector.broadcast %133 : vector<8x1xf32> to vector<8x32xf32>
    %135 = arith.mulf %130, %134 : vector<8x32xf32>
    %136 = vector.broadcast %13 : vector<1x32xf32> to vector<8x32xf32>
    %137 = arith.mulf %135, %136 : vector<8x32xf32>
    %138 = vector.broadcast %14 : vector<1x32xf32> to vector<8x32xf32>
    %139 = arith.addf %137, %138 : vector<8x32xf32>
    %140 = arith.truncf %139 : vector<8x32xf32> to vector<8x32xbf16>
    %141 = arith.index_cast %arg1 : i32 to index
    %c0_44 = arith.constant 0 : index
    %c0_45 = arith.constant 0 : index
    %142 = vector.load %arg7[%141, %c0_44, %c0_45] : memref<2x32x64xbf16, #tpu.memory_space<vmem>>, vector<1x32x64xbf16>
    %143 = vector.shape_cast %142 : vector<1x32x64xbf16> to vector<32x64xbf16>
    %cst_46 = arith.constant dense<0.000000e+00> : vector<8x64xf32>
    %144 = tpu.matmul %140, %143, %cst_46 {dimension_numbers = #tpu.dot_dimension_numbers<[1], [0], [0], [1], [0, 0, 1, 1], [], []>} : vector<8x32xbf16>, vector<32x64xbf16>, vector<8x64xf32> -> vector<8x64xf32>
    %145 = arith.index_cast %arg1 : i32 to index
    %c0_47 = arith.constant 0 : index
    %c0_48 = arith.constant 0 : index
    %146 = vector.load %arg10[%145, %c0_47, %c0_48] : memref<2x1x64xf32, #tpu.memory_space<vmem>>, vector<1x1x64xf32>
    %147 = vector.shape_cast %146 : vector<1x1x64xf32> to vector<1x64xf32>
    %148 = vector.broadcast %147 : vector<1x64xf32> to vector<8x64xf32>
    %149 = arith.addf %144, %148 : vector<8x64xf32>
    %cst_49 = arith.constant 0.000000e+00 : f32
    %150 = vector.broadcast %cst_49 : f32 to vector<8x64xf32>
    %151 = arith.maximumf %149, %150 : vector<8x64xf32>
    %152 = arith.truncf %151 : vector<8x64xf32> to vector<8x64xbf16>
    %153 = arith.index_cast %arg1 : i32 to index
    %c0_50 = arith.constant 0 : index
    %c0_51 = arith.constant 0 : index
    %154 = vector.load %arg8[%153, %c0_50, %c0_51] : memref<2x64x32xbf16, #tpu.memory_space<vmem>>, vector<1x64x32xbf16>
    %155 = vector.shape_cast %154 : vector<1x64x32xbf16> to vector<64x32xbf16>
    %cst_52 = arith.constant dense<0.000000e+00> : vector<8x32xf32>
    %156 = tpu.matmul %152, %155, %cst_52 {dimension_numbers = #tpu.dot_dimension_numbers<[1], [0], [0], [1], [0, 0, 1, 1], [], []>} : vector<8x64xbf16>, vector<64x32xbf16>, vector<8x32xf32> -> vector<8x32xf32>
    %157 = vector.broadcast %12 : vector<1x32xf32> to vector<8x32xf32>
    %158 = arith.addf %156, %157 : vector<8x32xf32>
    %159 = arith.addf %139, %158 : vector<8x32xf32>
    %cst_53 = arith.constant dense<0.000000e+00> : vector<8xf32>
    %160 = vector.multi_reduction <add>, %159, %cst_53 [1] : vector<8x32xf32> to vector<8xf32>
    %161 = vector.shape_cast %160 : vector<8xf32> to vector<8x1xf32>
    %cst_54 = arith.constant 3.200000e+01 : f32
    %162 = vector.broadcast %cst_54 : f32 to vector<8x1xf32>
    %163 = arith.divf %161, %162 : vector<8x1xf32>
    %164 = vector.broadcast %163 : vector<8x1xf32> to vector<8x32xf32>
    %165 = arith.subf %159, %164 : vector<8x32xf32>
    %166 = arith.mulf %165, %165 : vector<8x32xf32>
    %cst_55 = arith.constant dense<0.000000e+00> : vector<8xf32>
    %167 = vector.multi_reduction <add>, %166, %cst_55 [1] : vector<8x32xf32> to vector<8xf32>
    %168 = vector.shape_cast %167 : vector<8xf32> to vector<8x1xf32>
    %cst_56 = arith.constant 3.200000e+01 : f32
    %169 = vector.broadcast %cst_56 : f32 to vector<8x1xf32>
    %170 = arith.divf %168, %169 : vector<8x1xf32>
    %171 = vector.broadcast %163 : vector<8x1xf32> to vector<8x32xf32>
    %172 = arith.subf %159, %171 : vector<8x32xf32>
    %cst_57 = arith.constant 9.99999974E-6 : f32
    %173 = vector.broadcast %cst_57 : f32 to vector<8x1xf32>
    %174 = arith.addf %170, %173 : vector<8x1xf32>
    %175 = math.rsqrt %174 : vector<8x1xf32>
    %176 = vector.broadcast %175 : vector<8x1xf32> to vector<8x32xf32>
    %177 = arith.mulf %172, %176 : vector<8x32xf32>
    %178 = vector.broadcast %15 : vector<1x32xf32> to vector<8x32xf32>
    %179 = arith.mulf %177, %178 : vector<8x32xf32>
    %180 = vector.broadcast %16 : vector<1x32xf32> to vector<8x32xf32>
    %181 = arith.addf %179, %180 : vector<8x32xf32>
    %c0_58 = arith.constant 0 : index
    %c0_59 = arith.constant 0 : index
    %c0_60 = arith.constant 0 : index
    %182 = vector.load %arg11[%c0_58, %c0_59, %c0_60] : memref<1x8x32xf32, #tpu.memory_space<vmem>>, vector<1x8x32xf32>
    %183 = vector.shape_cast %182 : vector<1x8x32xf32> to vector<8x32xf32>
    %184 = vector.shape_cast %181 : vector<8x32xf32> to vector<1x8x32xf32>
    tpu.vector_store %arg11[%c0_58, %c0_59, %c0_60], %184 {strides = array<i32>} : memref<1x8x32xf32, #tpu.memory_space<vmem>>, vector<1x8x32xf32>,
    return
  }
  func.func @transform_0(%arg0: i32, %arg1: i32) -> (i32, i32, i32) {
    %c0_i32 = arith.constant 0 : i32
    %c0_i32_0 = arith.constant 0 : i32
    %c0_i32_1 = arith.constant 0 : i32
    return %arg0, %c0_i32, %c0_i32_0 : i32, i32, i32
  }
  func.func @transform_1(%arg0: i32, %arg1: i32) -> (i32, i32, i32) {
    %c0_i32 = arith.constant 0 : i32
    %c0_i32_0 = arith.constant 0 : i32
    %c0_i32_1 = arith.constant 0 : i32
    return %arg0, %c0_i32, %c0_i32_0 : i32, i32, i32
  }
  func.func @transform_2(%arg0: i32, %arg1: i32) -> (i32, i32, i32) {
    %c0_i32 = arith.constant 0 : i32
    %c0_i32_0 = arith.constant 0 : i32
    %c0_i32_1 = arith.constant 0 : i32
    %c0_i32_2 = arith.constant 0 : i32
    return %c0_i32, %c0_i32_0, %c0_i32_1 : i32, i32, i32
  }
  func.func @transform_3(%arg0: i32, %arg1: i32) -> (i32, i32, i32) {
    %c0_i32 = arith.constant 0 : i32
    %c0_i32_0 = arith.constant 0 : i32
    %c0_i32_1 = arith.constant 0 : i32
    %c0_i32_2 = arith.constant 0 : i32
    return %c0_i32, %c0_i32_0, %c0_i32_1 : i32, i32, i32
  }
  func.func @transform_4(%arg0: i32, %arg1: i32) -> (i32, i32, i32) {
    %c0_i32 = arith.constant 0 : i32
    %c0_i32_0 = arith.constant 0 : i32
    %c0_i32_1 = arith.constant 0 : i32
    %c0_i32_2 = arith.constant 0 : i32
    return %c0_i32, %c0_i32_0, %c0_i32_1 : i32, i32, i32
  }
  func.func @transform_5(%arg0: i32, %arg1: i32) -> (i32, i32, i32) {
    %c0_i32 = arith.constant 0 : i32
    %c0_i32_0 = arith.constant 0 : i32
    %c0_i32_1 = arith.constant 0 : i32
    %c0_i32_2 = arith.constant 0 : i32
    return %c0_i32, %c0_i32_0, %c0_i32_1 : i32, i32, i32
  }
  func.func @transform_6(%arg0: i32, %arg1: i32) -> (i32, i32, i32) {
    %c0_i32 = arith.constant 0 : i32
    %c0_i32_0 = arith.constant 0 : i32
    %c0_i32_1 = arith.constant 0 : i32
    %c0_i32_2 = arith.constant 0 : i32
    return %c0_i32, %c0_i32_0, %c0_i32_1 : i32, i32, i32
  }
  func.func @transform_7(%arg0: i32, %arg1: i32) -> (i32, i32, i32) {
    %c0_i32 = arith.constant 0 : i32
    %c0_i32_0 = arith.constant 0 : i32
    %c0_i32_1 = arith.constant 0 : i32
    %c0_i32_2 = arith.constant 0 : i32
    return %c0_i32, %c0_i32_0, %c0_i32_1 : i32, i32, i32
  }
  func.func @transform_8(%arg0: i32, %arg1: i32) -> (i32, i32, i32) {
    %c0_i32 = arith.constant 0 : i32
    %c0_i32_0 = arith.constant 0 : i32
    %c0_i32_1 = arith.constant 0 : i32
    %c0_i32_2 = arith.constant 0 : i32
    return %c0_i32, %c0_i32_0, %c0_i32_1 : i32, i32, i32
  }
  func.func @transform_9(%arg0: i32, %arg1: i32) -> (i32, i32, i32) {
    %c0_i32 = arith.constant 0 : i32
    %c0_i32_0 = arith.constant 0 : i32
    %c0_i32_1 = arith.constant 0 : i32
    return %arg0, %c0_i32, %c0_i32_0 : i32, i32, i32
  }
}

</mosaic_0001>

<bundles_post_ra>
// kernel: tpu_custom_call.1
= control target key start
LH: loop header
LB: loop body
LE: loop exit
PB: predicated region body
PF: predicated region fallthrough
CT: control target
= control target key end

     0   :  { %s2354_s0 = inlined_call_operand.hbm [shape: f32[2,8,32], index: 0, kind: input, shape index: {}]   ;;  %s2355_s1 = inlined_call_operand.hbm [shape: f32[2,8,32], index: 1, kind: input, shape index: {}]   ;;  %s2356_s2 = inlined_call_operand.vmem [shape: bf16[2,32,64], index: 2, kind: input, shape index: {}]   ;;  %s2357_s3 = inlined_call_operand.vmem [shape: bf16[2,32,32], index: 3, kind: input, shape index: {}]   ;;  %s2358_s4 = inlined_call_operand.vmem [shape: bf16[2,32,32], index: 4, kind: input, shape index: {}]   ;;  %s2359_s5 = inlined_call_operand.vmem [shape: bf16[2,32,64], index: 5, kind: input, shape index: {}]   ;;  %s2360_s6 = inlined_call_operand.vmem [shape: bf16[2,64,32], index: 6, kind: input, shape index: {}]   ;;  %s2361_s7 = inlined_call_operand.vmem [shape: f32[2,9,32], index: 7, kind: input, shape index: {}]   ;;  %s2362_s8 = inlined_call_operand.vmem [shape: f32[2,1,64], index: 8, kind: input, shape index: {}]   ;;  %s2363_s9 = inlined_call_operand.hbm [shape: f32[2,8,32], index: 9, kind: output, shape index: {}]  }
   0x1   :  { %2372 = sst [smem:[#allocation18_spill]] %s2354_s0 }
   0x2   :  { %14 = vsyncpa [#allocation4], 0 }
   0x3   :  { %16 = vsyncpa [#allocation4 + $0x1], 0 }
   0x4   :  { %17 = vsyncpa [#allocation7], 0 }
   0x5   :  { %19 = vsyncpa [#allocation7 + $0x1], 0 }
   0x6   :  { %20 = vsyncpa [#allocation5], 0 }
   0x7   :  { %22 = vsyncpa [#allocation5 + $0x1], 0  ;;  %s1962_s30 = smov 0   ;;  %s1964_s10 = smov 0  }
   0x8   :  { %s1966_s11 = smov 0   ;;  %s1968_s12 = smov 0  }
   0x9   :  { %s1970_s13 = smov 0   ;;  %s1972_s14 = smov 0  }
   0xa   :  { %s1974_s15 = smov 0   ;;  %s1976_s16 = smov 0  }
   0xb LB: > { %2373 = sst [smem:[#allocation12_spill]] %s1874_s11  ;;  %s1422_s17 = sadd.s32 4294967295, %s1894_s16   ;;  %s1894_s16 = sphi %s1976_s16, %s28_s16   ;;  %s1890_s15 = sphi %s1974_s15, %s2399_s15   ;;  %s1886_s14 = sphi %s1972_s14, %s2398_s14   ;;  %s1882_s13 = sphi %s1970_s13, %s2397_s13   ;;  %s1878_s12 = sphi %s1968_s12, %s2396_s12   ;;  %s1874_s11 = sphi %s1966_s11, %s2395_s11   ;;  %s1870_s10 = sphi %s1964_s10, %s2401_s10   ;;  %s1866_s30 = sphi %s1962_s30, %s2400_s30  }
   0xc   : > { %2374 = sst [smem:[#allocation13_spill]] %s1886_s14  ;;  %s1423_s18 = sadd.s32 4294967294, %s1894_s16  }
   0xd   : > { %2375 = sst [smem:[#allocation14_spill]] %s1890_s15  ;;  %s37_s19 = sadd.s32 1, %s1886_s14 }
   0xe   : > { %s40_s20 = sadd.s32 1, %s1890_s15  ;;  %p38_p0 = scmp.ge.s32.totalorder %s37_s19, 2 }
   0xf   : > { %s47_s21 = sadd.s32 1, %s1874_s11  ;;  %p54_p1 = scmp.ne.s32.totalorder %s1874_s11, %s1870_s10 }
  0x10   : > { %p55_p2 = scmp.eq.s32.totalorder %s1894_s16, 0  ;;  %s2403_s19 = smov (%p38_p0, %s37_s19), 0 }
  0x11   : > { %2376 = sst [smem:[#allocation15_spill]] %s2403_s19  ;;  %s2405_s20 = smov (!%p38_p0, %s40_s20), %s1890_s15 }
  0x12   : > { %p2013_p3 = por %p55_p2, %p54_p1  ;;  %p60_p4 = scmp.ne.s32.totalorder %s1870_s10, %s1866_s30 }
  0x13   : > { %p42_p5 = scmp.ge.s32.totalorder %s2405_s20, 2  ;;  %p61_p6 = scmp.eq.s32.totalorder %s1422_s17, 0 }
  0x14   : > { %p257_p7 = scmp.eq.s32.totalorder %s1422_s17, 3  ;;  %p263_p8 = scmp.eq.s32.totalorder %s1423_s18, 3 }
  0x15   : > { %s2407_s20 = smov (%p42_p5, %s2405_s20), 0  ;;  %p2021_p9 = por %p61_p6, %p60_p4 }
  0x16   : > { %2378 = sst [smem:[#allocation16_spill]] %s2407_s20  ;;  %p2025_p10 = por %p257_p7, %p54_p1 }
  0x17   : > { %s2379_s23 = scalar_select %p2021_p9, 1, 0 }
  0x18   : > { %s2380_s24 = scalar_select %p2025_p10, 1, 0 }
  0x19   : > { %s44_s25 = ssub.s32 %s1890_s15, %s2407_s20  ;;  %p2031_p11 = por %p263_p8, %p60_p4 }
  0x1a   : > { %p45_p12 = scmp.eq.s32.totalorder %s44_s25, 0  ;;  %p1621_p13 = scmp.lt.s32.totalorder %s1894_s16, 4 }
  0x1b   : > { %s2381_s26 = scalar_select %p2031_p11, 1, 0 }
  0x1c   : > { %s2037_s27 = sand.u32 1, %s1874_s11   ;;  %s2367_s17 = sshll.u32 %s1890_s15, 7 }
  0x1d   : > { %s2040_s28 = scalar_select %p45_p12, %s1874_s11, %s47_s21  }
  0x1e   : > { %s2366_s29 = sshll.u32 %s2037_s27, 3  ;;  %s2383_s0 = sld [smem:[#allocation18_spill]] }
  0x1f   : > { %2382 = sst [smem:[#allocation17_spill]] %s2040_s28  ;;  %s308_s25 = scalar_lea.vmem [#allocation3], %s2366_s29 }
  0x20   : > { %s315_s14 = sshll.u32 %s308_s25, 4  ;;  %p2057_p0 = pnand %p1621_p13, %p2013_p3  ;;  %s2053_s14 = int_to_ptr.vmem [resolvable:$true] %s315_s14 }
  0x21   : > { %s305_s19 = scalar_lea.sflag [#allocation4], %s2037_s27 }
  0x22   : > { %p1734_p5 = pneg %p2057_p0 }
  0x24   : > { %s2049_s20 = scalar_lea.hbm %s2383_s0, %s2367_s17  ;;  %s1737_s22 = scalar_lea.hbm %s2383_s0, 256 }
  0x25   : > { %s1732_s18 = scalar_lea.hbm %s2049_s20, 128  ;;  %p1738_p3 = scmp.lt.u32.totalorder %s2049_s20, %s2383_s0 }
  0x26   : > { %p1733_p4 = scmp.ne.s32.totalorder %s2049_s20, %s1732_s18  ;;  %p1739_p8 = scmp.lt.u32.totalorder %s1737_s22, %s1732_s18 }
  0x27   : > { %p1741_p13 = scmp.lt.u32.totalorder %s1732_s18, %s2049_s20 }
  0x28   : > { %p1735_p6 = pnand %p1734_p5, %p1733_p4  ;;  %p1740_p12 = por %p1739_p8, %p1738_p3 }
  0x2a   : > { %p1736_p7 = pneg %p1735_p6  ;;  %p1742_p1 = por %p1741_p13, %p1740_p12 }
  0x2c   : > { %p1743_p2 = pnand %p1742_p1, %p1736_p7 }
  0x2e   : > { %1746 = shalt.err (!%p1743_p2)
}
  0x2f   : > { %s1747_s11 = scalar_lea.vmem %s2053_s14, 128  ;;  %s1896_s29 = smov [#allocation3]  }
  0x30   : > { %p1748_p4 = scmp.ne.s32.totalorder %s2053_s14, %s1747_s11  ;;  %s1752_s25 = sshll.u32 %s1896_s29, 4  ;;  %s1753_s25 = int_to_ptr.vmem [resolvable:$false] %s1752_s25 }
  0x31   : > { %s1754_s28 = scalar_lea.vmem %s1753_s25, 256  ;;  %p1755_p10 = scmp.lt.s32.totalorder %s2053_s14, %s1753_s25 }
  0x32   : > { %p1750_p6 = pnand %p1748_p4, %p1734_p5  ;;  %p1756_p3 = scmp.lt.s32.totalorder %s1754_s28, %s1747_s11 }
  0x34   : > { %p1751_p11 = pneg %p1750_p6  ;;  %p1757_p8 = por %p1756_p3, %p1755_p10 }
  0x36   : > { %p1758_p12 = pnand %p1757_p8, %p1751_p11 }
  0x38   : > { %1761 = shalt.err (!%p1758_p12)
}
  0x39   : > { %1613 = dma.hbm_to_vmem [thread:$0]  (!%p2057_p0), %s2049_s20, 128, %s2053_s14, %s305_s19  }
  0x3a   : > { %p2385_p1 = scmp.lt.s32.totalorder %s1894_s16, 5  ;;  %p2386_p2 = scmp.ge.s32.totalorder %s1894_s16, 1 }
  0x3b   : > { %s2388_s11 = sshll.u32 %s1890_s15, 7  ;;  %s2389_s25 = sshll.u32 %s2037_s27, 3 }
  0x3c   : > { %p2093_p7 = pnand %p2386_p2, %p2385_p1  ;;  %s2102_s29 = scalar_lea.hbm %s2355_s1, %s2388_s11 }
  0x3d   : > { %s326_s28 = scalar_lea.vmem [#allocation6], %s2389_s25  ;;  %s323_s14 = scalar_lea.sflag [#allocation7], %s2037_s27 }
  0x3e   : > { %s2387_s17 = scalar_select %p2093_p7, 1, 0 }
  0x3f   : > { %s333_s0 = sshll.u32 %s326_s28, 4  ;;  %s1762_s20 = scalar_lea.hbm %s2102_s29, 128  ;;  %s334_s0 = int_to_ptr.vmem [resolvable:$true] %s333_s0 }
  0x40   : > { %p1763_p10 = scmp.ne.s32.totalorder %s2102_s29, %s1762_s20  ;;  %s1767_s11 = scalar_lea.hbm %s2355_s1, 256 }
  0x41   : > { %p1768_p4 = scmp.lt.u32.totalorder %s2102_s29, %s2355_s1  ;;  %p1769_p6 = scmp.lt.u32.totalorder %s1767_s11, %s1762_s20 }
  0x42   : > { %p1765_p11 = pnand %p1763_p10, %p1734_p5  ;;  %p1771_p8 = scmp.lt.u32.totalorder %s1762_s20, %s2102_s29 }
  0x43   : > { %p1770_p3 = por %p1769_p6, %p1768_p4 }
  0x44   : > { %p1766_p13 = pneg %p1765_p11 }
  0x45   : > { %p1772_p12 = por %p1771_p8, %p1770_p3 }
  0x47   : > { %p1773_p1 = pnand %p1772_p12, %p1766_p13 }
  0x49   : > { %1776 = shalt.err (!%p1773_p1)
}
  0x4a   : > { %s1777_s27 = scalar_lea.vmem %s334_s0, 128  ;;  %s1897_s25 = smov [#allocation6]  }
  0x4b   : > { %p1778_p2 = scmp.ne.s32.totalorder %s334_s0, %s1777_s27  ;;  %s1782_s15 = sshll.u32 %s1897_s25, 4  ;;  %s1783_s15 = int_to_ptr.vmem [resolvable:$false] %s1782_s15 }
  0x4c   : > { %s1784_s28 = scalar_lea.vmem %s1783_s15, 256  ;;  %p1785_p9 = scmp.lt.s32.totalorder %s334_s0, %s1783_s15 }
  0x4d   : > { %p1780_p10 = pnand %p1778_p2, %p1734_p5  ;;  %p1786_p7 = scmp.lt.s32.totalorder %s1784_s28, %s1777_s27 }
  0x4f   : > { %p1781_p11 = pneg %p1780_p10  ;;  %p1787_p4 = por %p1786_p7, %p1785_p9 }
  0x51   : > { %p1788_p6 = pnand %p1787_p4, %p1781_p11 }
  0x53   : > { %1791 = shalt.err (!%p1788_p6)
}
  0x54   : > { %1616 = dma.hbm_to_vmem [thread:$0]  (!%p2057_p0), %s2102_s29, 128, %s334_s0, %s323_s14  }
  0x55   : > { %p2390_p13 = scmp.ne.s32.totalorder %s2387_s17, 0 }
  0x56   : > { %s2129_s20 = sand.u32 (!%p2390_p13), 1, %s1870_s10   ;;  %p2391_p5 = scmp.ne.s32.totalorder (!%p2390_p13), %s2379_s23, 0 }
  0x57   : > { %342 = sbr.rel (%p2390_p13) target bundleno = 2482 (0x9b2), region = 56  ;;  %s1431_s19 = sshll.u32 (!%p2390_p13), %s2129_s20, 3 }
  0x58   : > { %s345_s11 = scalar_lea.sflag (!%p2390_p13), [#allocation4], %s2129_s20  ;;  %s348_s18 = scalar_lea.vmem (!%p2390_p13), [#allocation3], %s1431_s19 }
  0x5e   : > { %1853 = dma.done.wait (%p2391_p5), %s345_s11, 128  }
  0x5f   : > { %1855 = vsyncadd (%p2391_p5), %s345_s11, 4294967168  ;;  %s354_s0 = scalar_lea.sflag [#allocation7], %s2129_s20  ;;  %s357_s21 = scalar_lea.vmem [#allocation6], %s1431_s19 }
  0x60   : > { %1857 = dma.done.wait (%p2391_p5), %s354_s0, 128  }
  0x61   : > { %1859 = vsyncadd (%p2391_p5), %s354_s0, 4294967168  ;;  %s2142_s17 = scalar_lea.vmem [#allocation8], %s1431_s19  ;;  %p1434_p9 = scmp.ne.s32.totalorder %s1878_s12, 0 }
  0x62   : > { %v402_v0 = vld [vmem:[%s348_s18] sm:$0xff] (!%p1434_p9)  ;;  %vm403_vm0 = vcmask (!%p1434_p9), 261120  }
  0x63   : > { %401 = sbr.rel (%p1434_p9) target bundleno = 106 (0x6a), region = 68  ;;  %404 = vst.msk [vmem:[%s2142_s17] sm:$0xff] (!%p1434_p9), %vm403_vm0, %v402_v0 }
  0x6a PF: > { %s2147_s29 = sshll.u32 %s1878_s12, 4  ;;  %v2150_v1 = vld [vmem:[%s2142_s17] sm:$0xff]  ;;  %v410_v2 = vld [vmem:[%s357_s21] sm:$0xff]  ;;  %v477_v3 = vlaneseq  ;;  %v1898_v4 = vmov 0.0   ;;  %vm1899_vm1 = vmmov 0   ;;  %vm433_vm2 = vcmask 261120  }
  0x6b   : > { %1512 = vmatprep.subr.bf16.mxu1 %v1898_v4  ;;  %s416_s22 = scalar_lea.vmem %s2356_s2, %s2147_s29  ;;  %1516 = vmatprep.mubr.msk.bf16.mxu1 %vm1899_vm1, %v1898_v4  ;;  %s2163_s15 = scalar_lea.vmem %s2361_s7, %s2147_s29  ;;  %v411_v7 = vadd.f32 %v410_v2, %v2150_v1  ;;  %v413_v26 = vpack.c.bf16 %v2150_v1, %v2150_v1  ;;  %vm562_vm3 = vcmask 64512   ;;  %vm623_vm4 = vcmask 1043456  }
  0x6c   : > { %v1700_v5 = vld [vmem:[%s416_s22] sm:$0xff]   ;;  %v2165_v6 = vshrl.u32 %v477_v3, 7  ;;  %1528 = vmatprep.subr.bf16.mxu0 %v1898_v4  ;;  %1530 = vmatprep.mubr.msk.bf16.mxu0 %vm1899_vm1, %v1898_v4  ;;  %v1701_v8 = vld [vmem:[%s416_s22 + $0x8] sm:$0xff]   ;;  %s1900_s28 = smov 32   ;;  %s1901_s19 = smov 88   ;;  %vm785_vm5 = vcmask 130112  }
  0x6d   : > { %1513 = vmatpush3.bf16.msra.mxu1 %v1700_v5  ;;  %v2172_v9 = vld [vmem:[%s2163_s15] sm:$0xff]  ;;  %v412_v12 = vpack.c.bf16 %v411_v7, %v411_v7  ;;  %s1902_s11 = smov 96   ;;  %s1903_s18 = smov 80   ;;  %vm901_vm6 = vcmask 195712   ;;  %vm1017_vm7 = vcmask 261312   ;;  %vm1222_vm8 = vcmask 523264  }
  0x6e   : > { %v484_v10 = vsub.s32 1, %v2165_v6  ;;  %1514 = vmatprep.subr.bf16.mxu1 %v1898_v4  ;;  %v479_v13 = vsub.s32 0, %v2165_v6  ;;  %s1904_s0 = smov 120   ;;  %s1905_s21 = smov 72   ;;  %v499_v39 = vsub.s32 2, %v2165_v6 }
  0x6f   : > { %s1906_s23 = smov 112   ;;  %s1907_s14 = smov 104  }
  0x70   : > { %v485_v11 = vrot.slane %v2172_v9, %v484_v10  ;;  %v480_v15 = vrot.slane %v2172_v9, %v479_v13  ;;  %s492_s25 = scalar_lea.vmem %s2357_s3, %s2147_s29  ;;  %v500_v43 = vrot.slane %v2172_v9, %v499_v39  ;;  %s1113_s22 = scalar_lea.vmem %s2359_s5, %s2147_s29 }
  0x71   : > { %1515 = vmatpush3.bf16.msra.mxu1 %v1701_v8  ;;  %v1702_v24 = vld [vmem:[%s492_s25] sm:$0xff]   ;;  %v1703_v25 = vld [vmem:[%s492_s25 + $0x8] sm:$0xff]   ;;  %s1478_s27 = sshll.u32 %s1878_s12, 5  ;;  %p2392_p7 = scmp.ne.s32.totalorder %s2380_s24, 0 }
  0x72   : > { %487 = vrot.lane.b32.xlu0 %v485_v11, %s1900_s28  ;;  %1520 = vmatprep.subr.bf16.mxu1 %v1898_v4  ;;  %s1908_s28 = smov 8  }
  0x74   : > { %1517 = vmatmul.mubr.msk.bf16.vlgmr.msra.gmra.mrb[0].mxu1 %vm433_vm2, %v412_v12 }
  0x75   : > { %1524 = vmatprep.mubr.msk.bf16.mxu1 %vm1899_vm1, %v1898_v4  ;;  %1521 = vmatpush3.bf16.msra.mxu1 %v1702_v24 }
  0x76   : > { %1522 = vmatprep.subr.bf16.mxu1 %v1898_v4 }
  0x79   : > { %1523 = vmatpush3.bf16.msra.mxu1 %v1703_v25 }
  0x7a   : > { %1534 = vmatprep.subr.bf16.mxu1 %v1898_v4 }
  0x7c   : > { %1525 = vmatmul.mubr.msk.bf16.vlgmr.msra.gmra.mrb[4].mxu1 %vm433_vm2, %v413_v26 }
  0x7d   : > { %1536 = vmatprep.mubr.msk.bf16.mxu1 %vm1899_vm1, %v1898_v4 }
  0xe4   : > { %v488_v14 = vpop.permute.xlu0 %487 }
 0x147   : > { %v471_v16 = vpop.f32.mrb[0].mxu1 }
 0x148   : > { %v490_v17 = vadd.f32 %v488_v14, %v471_v16  ;;  %v1518_v18 = vpop.f32.mrb[1].mxu1  ;;  %v481_v20 = vadd.f32 %v480_v15, %v471_v16 }
 0x149   : > { %v474_v19 = vpop.f32.mrb[2].mxu1 }
 0x14a   : > { %v557_v21 = vpack.c.bf16 %v490_v17, %v490_v17  ;;  %v1519_v22 = vpop.f32.mrb[3].mxu1  ;;  %v556_v23 = vpack.c.bf16 %v481_v20, %v481_v20 }
 0x14c   : > { %672 = vrot.lane.b32.xlu1 %v557_v21, %s1901_s19  ;;  %560 = vrot.lane.b32.xlu0 %v557_v21, %s1902_s11  ;;  %s1185_s19 = scalar_lea.vmem %s2360_s6, %s1478_s27 }
 0x14f   : > { %v550_v38 = vpop.f32.mrb[4].mxu1 }
 0x150   : > { %789 = vrot.lane.b32.xlu0 %v557_v21, %s1903_s18  ;;  %670 = vrot.lane.b32.xlu1 %v556_v23, %s1904_s0  ;;  %v1526_v40 = vpop.f32.mrb[5].mxu1  ;;  %v551_v44 = vadd.f32 %v550_v38, %v500_v43  ;;  %s1022_s18 = scalar_lea.vmem %s2358_s4, %s2147_s29 }
 0x151   : > { %v553_v41 = vpop.f32.mrb[6].mxu1 }
 0x152   : > { %v1527_v42 = vpop.f32.mrb[7].mxu1  ;;  %v558_v45 = vpack.c.bf16 %v551_v44, %v551_v44 }
 0x154   : > { %905 = vrot.lane.b32.xlu0 %v557_v21, %s1905_s21  ;;  %787 = vrot.lane.b32.xlu1 %v556_v23, %s1906_s23  ;;  %v625_v46 = vsel %vm623_vm4, %v558_v45, 0  ;;  %s1910_s21 = smov 24  }
 0x155   : > { %1535 = vmatpush3.bf16.msra.mxu1 %v625_v46 }
 0x156   : > { %1546 = vmatprep.subr.bf16.mxu1 %v1898_v4 }
 0x158   : > { %903 = vrot.lane.b32.xlu1 %v556_v23, %s1907_s14 }
 0x1be   : > { %v561_v27 = vpop.permute.xlu0 %560  ;;  %v673_v29 = vpop.permute.xlu1 %672 }
 0x1bf   : > { %v567_v28 = vsel %vm562_vm3, %v561_v27, 0  ;;  %v678_v30 = vsel %vm562_vm3, %v673_v29, 0 }
 0x1c0   : > { %1529 = vmatpush3.bf16.xpose.msra.mxu0 %v567_v28 }
 0x1c1   : > { %1540 = vmatprep.subr.bf16.mxu0 %v1898_v4 }
 0x1c2   : > { %v790_v31 = vpop.permute.xlu0 %789  ;;  %v671_v32 = vpop.permute.xlu1 %670 }
 0x1c3   : > { %v795_v33 = vsel %vm562_vm3, %v790_v31, 0 }
 0x1c6   : > { %v906_v34 = vpop.permute.xlu0 %905  ;;  %v788_v35 = vpop.permute.xlu1 %787 }
 0x1c7   : > { %1531 = vmatmul.mubr.msk.bf16.vlgmr.msra.gmra.mrb[0].mxu0 %vm562_vm3, %v556_v23  ;;  %v911_v36 = vsel %vm562_vm3, %v906_v34, 0 }
 0x1c8   : > { %1541 = vmatpush3.bf16.xpose.msra.mxu0 %v678_v30  ;;  %1542 = vmatprep.mubr.msk.bf16.mxu0 %vm1899_vm1, %v1898_v4 }
 0x1c9   : > { %1552 = vmatprep.subr.bf16.mxu0 %v1898_v4 }
 0x1ca   : > { %v904_v37 = vpop.permute.xlu1 %903 }
 0x1cf   : > { %1543 = vmatmul.mubr.msk.bf16.vlgmr.msra.gmra.mrb[4].mxu0 %vm562_vm3, %v671_v32 }
 0x1d0   : > { %1553 = vmatpush3.bf16.xpose.msra.mxu0 %v795_v33  ;;  %1554 = vmatprep.mubr.msk.bf16.mxu0 %vm1899_vm1, %v1898_v4 }
 0x1d1   : > { %1564 = vmatprep.subr.bf16.mxu0 %v1898_v4 }
 0x1d7   : > { %1555 = vmatmul.mubr.msk.bf16.vlgmr.msra.gmra.mrb[8].mxu0 %vm562_vm3, %v788_v35 }
 0x1d8   : > { %1565 = vmatpush3.bf16.xpose.msra.mxu0 %v911_v36  ;;  %1566 = vmatprep.mubr.msk.bf16.mxu0 %vm1899_vm1, %v1898_v4 }
 0x1d9   : > { %1576 = vmatprep.subr.bf16.mxu0 %v1898_v4 }
 0x1df   : > { %1567 = vmatmul.mubr.msk.bf16.vlgmr.msra.gmra.mrb[12].mxu0 %vm562_vm3, %v904_v37 }
 0x1e0   : > { %1580 = vmatprep.mubr.msk.bf16.mxu0 %vm1899_vm1, %v1898_v4 }
 0x29a   : > { %v603_v47 = vpop.f32.mrb[0].mxu0 }
 0x29b   : > { %v1532_v48 = vpop.f32.mrb[1].mxu0  ;;  %v609_v49 = vsel %vm562_vm3, %v603_v47, -inf }
 0x29c   : > { %610 = vmax.xlane.f32.xlu0 %v609_v49  ;;  %v606_v50 = vpop.f32.mrb[2].mxu0 }
 0x29d   : > { %v1533_v51 = vpop.f32.mrb[3].mxu0 }
 0x2a2   : > { %v714_v52 = vpop.f32.mrb[4].mxu0 }
 0x2a3   : > { %v1544_v53 = vpop.f32.mrb[5].mxu0  ;;  %v720_v54 = vsel %vm562_vm3, %v714_v52, -inf }
 0x2a4   : > { %721 = vmax.xlane.f32.xlu1 %v720_v54  ;;  %v717_v55 = vpop.f32.mrb[6].mxu0  ;;  %v1704_v53 = vld [vmem:[%s1022_s18] sm:$0xff]  }
 0x2a5   : > { %v1545_v56 = vpop.f32.mrb[7].mxu0  ;;  %1577 = vmatpush3.bf16.msra.mxu0 %v1704_v53 }
 0x2a6   : > { %1578 = vmatprep.subr.bf16.mxu0 %v1898_v4 }
 0x2aa   : > { %v831_v57 = vpop.f32.mrb[8].mxu0 }
 0x2ab   : > { %v1556_v58 = vpop.f32.mrb[9].mxu0  ;;  %v837_v59 = vsel %vm562_vm3, %v831_v57, -inf }
 0x2ac   : > { %838 = vmax.xlane.f32.xlu0 %v837_v59  ;;  %v834_v60 = vpop.f32.mrb[10].mxu0  ;;  %v1705_v58 = vld [vmem:[%s1022_s18 + $0x8] sm:$0xff]   ;;  %s1118_s18 = scalar_lea.vmem %s2362_s8, %s1878_s12  ;;  %s1471_s12 = sshll.u32 %s1882_s13, 7 }
 0x2ad   : > { %v1557_v61 = vpop.f32.mrb[11].mxu0  ;;  %1579 = vmatpush3.bf16.msra.mxu0 %v1705_v58  ;;  %s1911_s13 = smov [#allocation8]  }
 0x2ae   : > { %1592 = vmatprep.subr.bf16.mxu0 %v1898_v4 }
 0x2b2   : > { %v947_v62 = vpop.f32.mrb[12].mxu0 }
 0x2b3   : > { %v1568_v63 = vpop.f32.mrb[13].mxu0  ;;  %v953_v0 = vsel %vm562_vm3, %v947_v62, -inf }
 0x2b4   : > { %954 = vmax.xlane.f32.xlu0 %v953_v0  ;;  %v950_v2 = vpop.f32.mrb[14].mxu0 }
 0x2b5   : > { %v1569_v3 = vpop.f32.mrb[15].mxu0  ;;  %732 = vrot.lane.b32.xlu1 %v558_v45, %s1904_s0  ;;  %s1909_s0 = smov 16  }
 0x2b9   : > { %964 = vrot.lane.b32.xlu1 %v558_v45, %s1907_s14  ;;  %s2298_s14 = scalar_lea.hbm %s2363_s9, %s1471_s12 }
 0x2ca   : > { %848 = vrot.lane.b32.xlu0 %v558_v45, %s1906_s23 }
 0x329   : > { %v611_v5 = vpop.xlane.xlu0 %610 }
 0x32a   : > { %v612_v7 = vsub.f32 %v603_v47, %v611_v5 }
 0x32c   : > { %v613_v8 = vmul.f32 1.442695, %v612_v7 }
 0x32e   : > { %1712 = vpow2.f32 %v613_v8 }
 0x331   : > { %v722_v10 = vpop.xlane.xlu1 %721 }
 0x332   : > { %v723_v11 = vsub.f32 %v714_v52, %v722_v10 }
 0x334   : > { %v724_v12 = vmul.f32 1.442695, %v723_v11 }
 0x335   : > { %v733_v14 = vpop.permute.xlu1 %732 }
 0x336   : > { %1714 = vpow2.f32 %v724_v12  ;;  %v738_v16 = vsel %vm623_vm4, %v733_v14, 0  ;;  %v1029_v12 = vsub.s32 3, %v2165_v6 }
 0x338   : > { %v1713_v13 = vpop.eup %1712 }
 0x339   : > { %v839_v15 = vpop.xlane.xlu0 %838  ;;  %v619_v17 = vpack.c.bf16 %v1713_v13, %v1713_v13  ;;  %v615_v27 = vsel %vm562_vm3, %v1713_v13, 0.0  ;;  %v965_v30 = vpop.permute.xlu1 %964  ;;  %v1030_v13 = vrot.slane %v2172_v9, %v1029_v12 }
 0x33a   : > { %v840_v18 = vsub.f32 %v831_v57, %v839_v15  ;;  %v970_v33 = vsel %vm623_vm4, %v965_v30, 0 }
 0x33b   : > { %1537 = vmatmul.mubr.msk.bf16.vlgmr.msra.gmra.mrb[8].mxu1 %vm562_vm3, %v619_v17 }
 0x33c   : > { %v841_v19 = vmul.f32 1.442695, %v840_v18  ;;  %1547 = vmatpush3.bf16.msra.mxu1 %v738_v16  ;;  %1548 = vmatprep.mubr.msk.bf16.mxu1 %vm1899_vm1, %v1898_v4 }
 0x33d   : > { %1558 = vmatprep.subr.bf16.mxu1 %v1898_v4 }
 0x33e   : > { %1716 = vpow2.f32 %v841_v19 }
 0x340   : > { %v1715_v20 = vpop.eup %1714 }
 0x341   : > { %v955_v21 = vpop.xlane.xlu0 %954  ;;  %v726_v22 = vsel %vm562_vm3, %v1715_v20, 0.0  ;;  %v730_v23 = vpack.c.bf16 %v1715_v20, %v1715_v20 }
 0x342   : > { %v956_v24 = vsub.f32 %v947_v62, %v955_v21  ;;  %727 = vadd.xlane.f32.xlu1 %v726_v22 }
 0x343   : > { %1549 = vmatmul.mubr.msk.bf16.vlgmr.msra.gmra.mrb[12].mxu1 %vm562_vm3, %v730_v23 }
 0x344   : > { %v957_v25 = vmul.f32 1.442695, %v956_v24  ;;  %1560 = vmatprep.mubr.msk.bf16.mxu1 %vm1899_vm1, %v1898_v4 }
 0x345   : > { %v849_v26 = vpop.permute.xlu0 %848 }
 0x346   : > { %1718 = vpow2.f32 %v957_v25  ;;  %v854_v28 = vsel %vm623_vm4, %v849_v26, 0  ;;  %616 = vadd.xlane.f32.xlu1 %v615_v27  ;;  %v1706_v26 = vld [vmem:[%s1113_s22] sm:$0xff]   ;;  %v1707_v27 = vld [vmem:[%s1113_s22 + $0x8] sm:$0xff]   ;;  %s1292_s22 = scalar_lea.sflag [#allocation5], %s2129_s20 }
 0x347   : > { %1559 = vmatpush3.bf16.msra.mxu1 %v854_v28  ;;  %v1709_v28 = vld [vmem:[%s1185_s19 + $0x8] sm:$0xff]  }
 0x348   : > { %v1717_v29 = vpop.eup %1716  ;;  %1570 = vmatprep.subr.bf16.mxu1 %v1898_v4 }
 0x349   : > { %v843_v31 = vsel %vm562_vm3, %v1717_v29, 0.0  ;;  %v847_v32 = vpack.c.bf16 %v1717_v29, %v1717_v29 }
 0x34a   : > { %844 = vadd.xlane.f32.xlu0 %v843_v31 }
 0x34b   : > { %1561 = vmatmul.mubr.msk.bf16.vlgmr.msra.gmra.mrb[16].mxu1 %vm562_vm3, %v847_v32  ;;  %v1103_v32 = vsub.s32 5, %v2165_v6 }
 0x34c   : > { %1571 = vmatpush3.bf16.msra.mxu1 %v970_v33  ;;  %1572 = vmatprep.mubr.msk.bf16.mxu1 %vm1899_vm1, %v1898_v4  ;;  %v1108_v33 = vsub.s32 6, %v2165_v6 }
 0x34d   : > { %1584 = vmatprep.subr.bf16.mxu1 %v1898_v4 }
 0x350   : > { %v1719_v34 = vpop.eup %1718 }
 0x351   : > { %v959_v35 = vsel %vm562_vm3, %v1719_v34, 0.0  ;;  %v963_v36 = vpack.c.bf16 %v1719_v34, %v1719_v34  ;;  %v1104_v34 = vrot.slane %v2172_v9, %v1103_v32 }
 0x352   : > { %960 = vadd.xlane.f32.xlu0 %v959_v35 }
 0x353   : > { %1573 = vmatmul.mubr.msk.bf16.vlgmr.msra.gmra.mrb[20].mxu1 %vm562_vm3, %v963_v36 }
 0x354   : > { %1588 = vmatprep.mubr.msk.bf16.mxu1 %vm1899_vm1, %v1898_v4  ;;  %1585 = vmatpush3.bf16.msra.mxu1 %v1706_v26 }
 0x355   : > { %1586 = vmatprep.subr.bf16.mxu1 %v1898_v4 }
 0x358   : > { %1587 = vmatpush3.bf16.msra.mxu1 %v1707_v27 }
 0x3cf   : > { %v728_v37 = vpop.xlane.xlu1 %727 }
 0x3d3   : > { %v617_v38 = vpop.xlane.xlu1 %616 }
 0x3d4   : > { %1720 = vrcp.f32 %v617_v38 }
 0x3d5   : > { %1722 = vrcp.f32 %v728_v37  ;;  %v1109_v37 = vrot.slane %v2172_v9, %v1108_v33 }
 0x3d7   : > { %v845_v44 = vpop.xlane.xlu0 %844 }
 0x3d8   : > { %1724 = vrcp.f32 %v845_v44 }
 0x3de   : > { %v1721_v39 = vpop.eup %1720 }
 0x3df   : > { %v1723_v46 = vpop.eup %1722  ;;  %v961_v51 = vpop.xlane.xlu0 %960 }
 0x3e0   : > { %1726 = vrcp.f32 %v961_v51  ;;  %v1196_v51 = vsub.s32 4, %v2165_v6 }
 0x3e2   : > { %v1725_v54 = vpop.eup %1724 }
 0x3ea   : > { %v1727_v61 = vpop.eup %1726 }
 0x40e   : > { %v661_v40 = vpop.f32.mrb[8].mxu1 }
 0x40f   : > { %v667_v41 = vmul.f32 %v1721_v39, %v661_v40  ;;  %v1538_v42 = vpop.f32.mrb[9].mxu1 }
 0x410   : > { %v664_v43 = vpop.f32.mrb[10].mxu1  ;;  %v1711_v42 = vld [vmem:[%s1185_s19 + $0x18] sm:$0xff]  }
 0x411   : > { %668 = vst.msk [vmem:[#allocation2] sm:$0xff] %vm562_vm3, %v667_v41  ;;  %v1539_v45 = vpop.f32.mrb[11].mxu1  ;;  %v1710_v41 = vld [vmem:[%s1185_s19 + $0x10] sm:$0xff]   ;;  %v1458_v43 = vld [vmem:[%s1118_s18] ss:$0 sm:$0xff] }
 0x416   : > { %v774_v47 = vpop.f32.mrb[12].mxu1 }
 0x417   : > { %v780_v48 = vmul.f32 %v1723_v46, %v774_v47  ;;  %v1550_v49 = vpop.f32.mrb[13].mxu1 }
 0x418   : > { %v777_v50 = vpop.f32.mrb[14].mxu1 }
 0x419   : > { %782 = vrot.lane.b32.xlu0 %v780_v48, %s1908_s28  ;;  %v1551_v52 = vpop.f32.mrb[15].mxu1 }
 0x41e   : > { %v890_v55 = vpop.f32.mrb[16].mxu1 }
 0x41f   : > { %v896_v56 = vmul.f32 %v1725_v54, %v890_v55  ;;  %v1562_v57 = vpop.f32.mrb[17].mxu1 }
 0x420   : > { %v893_v59 = vpop.f32.mrb[18].mxu1 }
 0x421   : > { %898 = vrot.lane.b32.xlu1 %v896_v56, %s1909_s0  ;;  %v1563_v60 = vpop.f32.mrb[19].mxu1  ;;  %s1305_s0 = sshll.u32 %s2142_s17, 4  ;;  %s2300_s0 = int_to_ptr.vmem [resolvable:$true] %s1305_s0 }
 0x422   : > { %s1792_s27 = scalar_lea.vmem %s2300_s0, 128 }
 0x423   : > { %p1793_p0 = scmp.ne.s32.totalorder %s2300_s0, %s1792_s27 }
 0x425   : > { %p1794_p3 = pnand %p1793_p0, %p2392_p7 }
 0x426   : > { %v1006_v62 = vpop.f32.mrb[20].mxu1 }
 0x427   : > { %v1012_v63 = vmul.f32 %v1727_v61, %v1006_v62  ;;  %v1574_v0 = vpop.f32.mrb[21].mxu1  ;;  %p1795_p8 = pneg %p1794_p3 }
 0x428   : > { %v1009_v2 = vpop.f32.mrb[22].mxu1 }
 0x429   : > { %1014 = vrot.lane.b32.xlu1 %v1012_v63, %s1910_s21  ;;  %v1575_v3 = vpop.f32.mrb[23].mxu1 }
 0x48b   : > { %v783_v5 = vpop.permute.xlu0 %782 }
 0x48c   : > { %786 = vst.msk [vmem:[#allocation2] sm:$0xff] %vm785_vm5, %v783_v5  ;;  %v1282_v5 = vsub.s32 7, %v2165_v6 }
 0x493   : > { %v899_v7 = vpop.permute.xlu1 %898 }
 0x494   : > { %902 = vst.msk [vmem:[#allocation2] sm:$0xff] %vm901_vm6, %v899_v7  ;;  %v1283_v7 = vrot.slane %v2172_v9, %v1282_v5 }
 0x49b   : > { %v1015_v8 = vpop.permute.xlu1 %1014 }
 0x49c   : > { %1018 = vst.msk [vmem:[#allocation2] sm:$0xff] %vm1017_vm7, %v1015_v8 }
 0x4a3   : > { %v1019_v10 = vld [vmem:[#allocation2] sm:$0xff] }
 0x4a4   : > { %v1020_v11 = vpack.c.bf16 %v1019_v10, %v1019_v10 }
 0x4a6   : > { %1581 = vmatmul.mubr.msk.bf16.vlgmr.msra.gmra.mrb[16].mxu0 %vm433_vm2, %v1020_v11  ;;  %v1469_v11 = vld [vmem:[%s2163_s15 + $0x8] ss:$0 sm:$0xff]  ;;  %s1796_s15 = sshll.u32 %s1911_s13, 4  ;;  %s1797_s15 = int_to_ptr.vmem [resolvable:$false] %s1796_s15 }
 0x4a7   : > { %1600 = vmatprep.mubr.msk.bf16.mxu0 %vm1899_vm1, %v1898_v4  ;;  %s1798_s25 = scalar_lea.vmem %s1797_s15, 256  ;;  %p1799_p12 = scmp.lt.s32.totalorder %s2300_s0, %s1797_s15 }
 0x4a8   : > { %p1800_p1 = scmp.lt.s32.totalorder %s1798_s25, %s1792_s27 }
 0x4aa   : > { %p1801_p2 = por %p1800_p1, %p1799_p12 }
 0x4ac   : > { %p1802_p10 = pnand %p1801_p2, %p1795_p8 }
 0x579   : > { %v1080_v14 = vpop.f32.mrb[16].mxu0 }
 0x57a   : > { %v1081_v15 = vadd.f32 %v1080_v14, %v1030_v13  ;;  %v1582_v16 = vpop.f32.mrb[17].mxu0 }
 0x57b   : > { %v1083_v17 = vpop.f32.mrb[18].mxu0 }
 0x57c   : > { %v1583_v18 = vpop.f32.mrb[19].mxu0  ;;  %v1086_v19 = vadd.f32 %v1081_v15, %v2150_v1  ;;  %v1708_v1 = vld [vmem:[%s1185_s19] sm:$0xff]  }
 0x57d   : > { %1593 = vmatpush3.bf16.msra.mxu0 %v1708_v1 }
 0x57e   : > { %v1087_v20 = vsel %vm433_vm2, %v1086_v19, 0.0  ;;  %1594 = vmatprep.subr.bf16.mxu0 %v1898_v4 }
 0x57f   : > { %1088 = vadd.xlane.f32.xlu0 %v1087_v20 }
 0x581   : > { %1595 = vmatpush3.bf16.msra.mxu0 %v1709_v28 }
 0x582   : > { %1596 = vmatprep.subr.bf16.mxu0 %v1898_v4 }
 0x585   : > { %1597 = vmatpush3.bf16.msra.mxu0 %v1710_v41 }
 0x586   : > { %1598 = vmatprep.subr.bf16.mxu0 %v1898_v4  ;;  %v1197_v4 = vrot.slane %v2172_v9, %v1196_v51 }
 0x589   : > { %1599 = vmatpush3.bf16.msra.mxu0 %v1711_v42 }
 0x60c   : > { %v1089_v21 = vpop.xlane.xlu0 %1088 }
 0x60d   : > { %v1091_v22 = vmul.f32 0.03125, %v1089_v21 }
 0x60f   : > { %v1092_v23 = vsub.f32 %v1086_v19, %v1091_v22 }
 0x611   : > { %v1093_v24 = vmul.f32 %v1092_v23, %v1092_v23 }
 0x613   : > { %v1094_v25 = vsel %vm433_vm2, %v1093_v24, 0.0 }
 0x614   : > { %1095 = vadd.xlane.f32.xlu1 %v1094_v25 }
 0x6a1   : > { %v1096_v29 = vpop.xlane.xlu1 %1095 }
 0x6a2   : > { %v1097_v30 = vmul.f32 0.03125, %v1096_v29 }
 0x6a4   : > { %v1098_v31 = vadd.f32 1e-05, %v1097_v30 }
 0x6a6   : > { %1728 = vrsqrt.f32 %v1098_v31 }
 0x6b0   : > { %v1729_v35 = vpop.eup %1728 }
 0x6b1   : > { %v1100_v36 = vmul.f32 %v1729_v35, %v1092_v23 }
 0x6b3   : > { %v1105_v38 = vmul.f32 %v1104_v34, %v1100_v36 }
 0x6b5   : > { %v1110_v39 = vadd.f32 %v1109_v37, %v1105_v38 }
 0x6b7   : > { %v1111_v40 = vpack.c.bf16 %v1110_v39, %v1110_v39 }
 0x6b9   : > { %1589 = vmatmul.mubr.msk.bf16.vlgmr.msra.gmra.mrb[24].mxu1 %vm433_vm2, %v1111_v40 }
 0x78c   : > { %v1175_v44 = vpop.f32.mrb[24].mxu1 }
 0x78d   : > { %v1176_v45 = vadd.f32 %v1458_v43, %v1175_v44  ;;  %v1590_v46 = vpop.f32.mrb[25].mxu1 }
 0x78e   : > { %v1178_v47 = vpop.f32.mrb[26].mxu1 }
 0x78f   : > { %v1181_v48 = vmax.f32 %v1176_v45, 0.0  ;;  %v1591_v49 = vpop.f32.mrb[27].mxu1 }
 0x791   : > { %v1182_v50 = vpack.c.bf16 %v1181_v48, %v1181_v48 }
 0x793   : > { %1601 = vmatmul.mubr.msk.bf16.vlgmr.msra.gmra.mrb[20].mxu0 %vm1222_vm8, %v1182_v50 }
 0x866   : > { %v1260_v52 = vpop.f32.mrb[20].mxu0 }
 0x867   : > { %v1261_v53 = vadd.f32 %v1260_v52, %v1197_v4  ;;  %v1602_v54 = vpop.f32.mrb[21].mxu0 }
 0x868   : > { %v1263_v55 = vpop.f32.mrb[22].mxu0 }
 0x869   : > { %v1603_v56 = vpop.f32.mrb[23].mxu0  ;;  %v1266_v57 = vadd.f32 %v1261_v53, %v1110_v39 }
 0x86b   : > { %v1267_v58 = vsel %vm433_vm2, %v1266_v57, 0.0 }
 0x86c   : > { %1268 = vadd.xlane.f32.xlu0 %v1267_v58 }
 0x8f9   : > { %v1269_v59 = vpop.xlane.xlu0 %1268 }
 0x8fa   : > { %v1270_v60 = vmul.f32 0.03125, %v1269_v59 }
 0x8fc   : > { %v1271_v61 = vsub.f32 %v1266_v57, %v1270_v60 }
 0x8fe   : > { %v1272_v62 = vmul.f32 %v1271_v61, %v1271_v61 }
 0x900   : > { %v1273_v63 = vsel %vm433_vm2, %v1272_v62, 0.0 }
 0x901   : > { %1274 = vadd.xlane.f32.xlu0 %v1273_v63 }
 0x98e   : > { %v1275_v0 = vpop.xlane.xlu0 %1274 }
 0x98f   : > { %v1276_v2 = vmul.f32 0.03125, %v1275_v0 }
 0x991   : > { %v1277_v3 = vadd.f32 1e-05, %v1276_v2 }
 0x993   : > { %1730 = vrsqrt.f32 %v1277_v3 }
 0x99d   : > { %v1731_v8 = vpop.eup %1730 }
 0x99e   : > { %v1279_v10 = vmul.f32 %v1731_v8, %v1271_v61 }
 0x9a0   : > { %v1284_v12 = vmul.f32 %v1283_v7, %v1279_v10 }
 0x9a2   : > { %v1289_v13 = vadd.f32 %v1469_v11, %v1284_v12 }
 0x9a4   : > { %1290 = vst.msk [vmem:[%s2142_s17] sm:$0xff] %vm433_vm2, %v1289_v13 }
 0x9a5   : > { %1805 = shalt.err (!%p1802_p10)
}
 0x9a6   : > { %s1806_s20 = scalar_lea.hbm %s2298_s14, 128  ;;  %s1810_s19 = scalar_lea.hbm %s2363_s9, 256 }
 0x9a7   : > { %p1807_p11 = scmp.ne.s32.totalorder %s2298_s14, %s1806_s20  ;;  %p1811_p13 = scmp.lt.u32.totalorder %s2298_s14, %s2363_s9 }
 0x9a8   : > { %p1812_p5 = scmp.lt.u32.totalorder %s1810_s19, %s1806_s20  ;;  %p1814_p0 = scmp.lt.u32.totalorder %s1806_s20, %s2298_s14 }
 0x9a9   : > { %p1808_p4 = pnand %p1807_p11, %p2392_p7 }
 0x9aa   : > { %p1813_p9 = por %p1812_p5, %p1811_p13 }
 0x9ab   : > { %p1809_p6 = pneg %p1808_p4 }
 0x9ac   : > { %p1815_p3 = por %p1814_p0, %p1813_p9 }
 0x9ae   : > { %p1816_p8 = pnand %p1815_p3, %p1809_p6 }
 0x9b0   : > { %1819 = shalt.err (!%p1816_p8)
}
 0x9b1   : > { %1608 = dma.vmem_to_hbm [thread:$0]  (%p2392_p7), %s2300_s0, 128, %s2298_s14, %s1292_s22  }
 0x9b2 PF: > { %p1622_p12 = scmp.ge.s32.totalorder %s1894_s16, 2  ;;  %s1317_s18 = sand.u32 1, %s1866_s30  }
 0x9b3   : > { %p2393_p1 = scmp.ne.s32.totalorder %s2381_s26, 0  ;;  %s1318_s12 = scalar_lea.sflag [#allocation5], %s1317_s18 }
 0x9b5   : > { %p1618_p2 = pnand %p1622_p12, %p2393_p1 }
 0x9b7   : > { %1861 = dma.done.wait (!%p1618_p2), %s1318_s12, 128  }
 0x9b8   : > { %1863 = vsyncadd (!%p1618_p2), %s1318_s12, 4294967168  ;;  %s28_s16 = sadd.s32 1, %s1894_s16   ;;  %s2394_s21 = sld [smem:[#allocation12_spill]] }
 0x9b9   : > { %p25_p10 = scmp.ge.s32.totalorder %s28_s16, 6   ;;  %s2395_s11 = sld [smem:[#allocation17_spill]] }
 0x9ba   : > { %s2396_s12 = sld [smem:[#allocation13_spill]]  ;;  %s2397_s13 = sld [smem:[#allocation14_spill]] }
 0x9bb   : > { %s2398_s14 = sld [smem:[#allocation15_spill]]  ;;  %s2399_s15 = sld [smem:[#allocation16_spill]] }
 0x9bc   : > { %s2400_s30 = smov %s1870_s10  ;;  %27 = sbr.rel (!%p25_p10) target bundleno = 11 (0xb), region = 125 }
 0x9be   : > { %s2401_s10 = smov %s2394_s21 }
 0x9c3   :  { %1323 = vsyncpa [#allocation4], 1 }
 0x9c4   :  { %1325 = vsyncpa [#allocation4 + $0x1], 1 }
 0x9c5   :  { %1326 = vsyncpa [#allocation7], 1 }
 0x9c6   :  { %1328 = vsyncpa [#allocation7 + $0x1], 1 }
 0x9c7   :  { %1329 = vsyncpa [#allocation5], 1 }
 0x9c8   :  { %1331 = vsyncpa [#allocation5 + $0x1], 1 }

</bundles_post_ra>
